<compile_context>
chip_gen: v7x
topology: tpu7x:2x2x1
jax: 0.10.0
libtpu: 0.0.40
codegen_flags: <defaults>
</compile_context>

<pallas_src>
import functools

import jax
import jax.numpy as jnp
from jax.experimental import pallas as pl
from jax.experimental.pallas import tpu as pltpu

KH, KW = 3, 3
CIN, COUT = 3, 6


def _conv2d_kernel(x_ref, w_ref, b_ref, o_ref, *, img_w):
    # x_ref: (1, Cin, H*W)        channel-major, pixels on the lane axis
    # w_ref: (Cout, KH*KW*Cin)    columns ordered as (kh, kw, cin)
    # b_ref: (Cout, 1)
    # o_ref: (1, Cout, H*W)       "wide" output map; wrapper slices the valid region
    x = x_ref[0]                  # (Cin, HW)
    hw = x.shape[-1]

    acc = jnp.zeros((COUT, hw), jnp.float32)
    for kh in range(KH):
        for kw in range(KW):
            s = kh * img_w + kw
            # x_s[:, p] = x[:, (p + s) % HW]; the lane rotation runs on the XLU
            # slot (no VMEM copy).  Wrapped positions only land on invalid output
            # pixels, which the wrapper discards.
            x_s = x if s == 0 else pltpu.roll(x, shift=hw - s, axis=1)
            tap = kh * KW + kw
            w_tap = w_ref[:, tap * CIN:(tap + 1) * CIN]          # (Cout, Cin)
            acc = acc + jnp.dot(w_tap, x_s,
                                preferred_element_type=jnp.float32)
    acc = acc + b_ref[...]        # (Cout, 1) broadcast along lanes
    o_ref[0] = acc.astype(o_ref.dtype)


@jax.jit
def one_net_forward(x_nchw, w_oihw, bias):
    """x_nchw: (N, 3, H, W); w_oihw: (6, 3, 3, 3); bias: (6,) -> (N, 6, H-2, W-2)."""
    N, C, H, W = x_nchw.shape
    Ho, Wo = H - KH + 1, W - KW + 1
    HW = H * W

    x_flat = x_nchw.reshape(N, C, HW)                             # free reshape (no copy)
    # (O, I, KH, KW) -> (O, KH, KW, I) -> (O, 27): tiny one-time parameter reorder.
    w_flat = jnp.transpose(w_oihw, (0, 2, 3, 1)).reshape(COUT, KH * KW * CIN)
    b2d = bias.reshape(COUT, 1)

    out_wide = pl.pallas_call(
        functools.partial(_conv2d_kernel, img_w=W),
        out_shape=jax.ShapeDtypeStruct((N, COUT, HW), x_nchw.dtype),
        grid_spec=pltpu.PrefetchScalarGridSpec(
            num_scalar_prefetch=0,
            grid=(N,),
            in_specs=[
                pl.BlockSpec((1, CIN, HW), lambda n: (n, 0, 0)),
                pl.BlockSpec((COUT, KH * KW * CIN), lambda n: (0, 0)),
                pl.BlockSpec((COUT, 1), lambda n: (0, 0)),
            ],
            out_specs=pl.BlockSpec((1, COUT, HW), lambda n: (n, 0, 0)),
        ),
        compiler_params=pltpu.CompilerParams(
            dimension_semantics=("parallel",)),
    )(x_flat, w_flat, b2d)

    # Valid-region extraction: free reshape + tiny slice; output already NCHW-ordered.
    return out_wide.reshape(N, COUT, H, W)[:, :, :Ho, :Wo]


if __name__ == "__main__":
    key = jax.random.PRNGKey(0)
    kx, kw, kb = jax.random.split(key, 3)

    # Small deterministic shapes consistent with the module (Conv2d expects 3 input channels).
    N, H, W = 2, 16, 16
    x = jax.random.normal(kx, (N, CIN, H, W), dtype=jnp.float32)

    # Deterministic parameter init (PyTorch Conv2d-like uniform fan-in bound).
    fan_in = CIN * KH * KW
    bound = 1.0 / (fan_in ** 0.5)
    w = jax.random.uniform(kw, (COUT, CIN, KH, KW), jnp.float32, -bound, bound)
    b = jax.random.uniform(kb, (COUT,), jnp.float32, -bound, bound)

    out = one_net_forward(x, w, b)
    out = jax.block_until_ready(out)

    # Reference check against XLA conv (NCHW, valid padding).
    ref = jax.lax.conv_general_dilated(
        x, w, window_strides=(1, 1), padding="VALID",
        dimension_numbers=("NCHW", "OIHW", "NCHW")) + b.reshape(1, COUT, 1, 1)
    assert out.shape == (N, COUT, H - 2, W - 2)
    assert jnp.allclose(out, ref, atol=1e-4, rtol=1e-4)

    print("KERNEL_OK")
</pallas_src>

<mosaic_0001>
module attributes {stable_mosaic.version = 11 : i64} {
  func.func @_conv2d_kernel(%arg0: i32, %arg1: memref<1x3x256xf32, #tpu.memory_space<vmem>>, %arg2: memref<6x27xf32, #tpu.memory_space<vmem>>, %arg3: memref<6x1xf32, #tpu.memory_space<vmem>>, %arg4: memref<1x6x256xf32, #tpu.memory_space<vmem>>) attributes {dimension_semantics = [#tpu.dimension_semantics<parallel>], iteration_bounds = array<i64: 2>, scalar_prefetch = 0 : i64, scratch_operands = 0 : i64, tpu.core_type = #tpu.core_type<tc>, window_params = [{transform_indices = @transform_0, window_bounds = array<i64: 1, 3, 256>}, {pipeline_mode = #tpu.pipeline_mode<synchronous>, transform_indices = @transform_1, window_bounds = array<i64: 6, 27>}, {pipeline_mode = #tpu.pipeline_mode<synchronous>, transform_indices = @transform_2, window_bounds = array<i64: 6, 1>}, {transform_indices = @transform_3, window_bounds = array<i64: 1, 6, 256>}]} {
    %c0 = arith.constant 0 : index
    %c0_0 = arith.constant 0 : index
    %c0_1 = arith.constant 0 : index
    %0 = vector.load %arg1[%c0, %c0_0, %c0_1] : memref<1x3x256xf32, #tpu.memory_space<vmem>>, vector<1x3x256xf32>
    %1 = vector.shape_cast %0 : vector<1x3x256xf32> to vector<3x256xf32>
    %cst = arith.constant 0.000000e+00 : f32
    %2 = vector.broadcast %cst : f32 to vector<6x256xf32>
    %c0_2 = arith.constant 0 : index
    %c0_3 = arith.constant 0 : index
    %3 = vector.load %arg2[%c0_2, %c0_3] : memref<6x27xf32, #tpu.memory_space<vmem>>, vector<6x3xf32>
    %cst_4 = arith.constant dense<0.000000e+00> : vector<6x256xf32>
    %4 = tpu.matmul %3, %1, %cst_4 {dimension_numbers = #tpu.dot_dimension_numbers<[1], [0], [0], [1], [0, 0, 1, 1], [], []>} : vector<6x3xf32>, vector<3x256xf32>, vector<6x256xf32> -> vector<6x256xf32>
    %5 = arith.addf %2, %4 : vector<6x256xf32>
    %c255_i32 = arith.constant 255 : i32
    %6 = tpu.dynamic_rotate %1 by %c255_i32 dim 1 : vector<3x256xf32>, i32 -> vector<3x256xf32>
    %c0_5 = arith.constant 0 : index
    %c3 = arith.constant 3 : index
    %7 = vector.load %arg2[%c0_5, %c3] : memref<6x27xf32, #tpu.memory_space<vmem>>, vector<6x3xf32>
    %cst_6 = arith.constant dense<0.000000e+00> : vector<6x256xf32>
    %8 = tpu.matmul %7, %6, %cst_6 {dimension_numbers = #tpu.dot_dimension_numbers<[1], [0], [0], [1], [0, 0, 1, 1], [], []>} : vector<6x3xf32>, vector<3x256xf32>, vector<6x256xf32> -> vector<6x256xf32>
    %9 = arith.addf %5, %8 : vector<6x256xf32>
    %c254_i32 = arith.constant 254 : i32
    %10 = tpu.dynamic_rotate %1 by %c254_i32 dim 1 : vector<3x256xf32>, i32 -> vector<3x256xf32>
    %c0_7 = arith.constant 0 : index
    %c6 = arith.constant 6 : index
    %11 = vector.load %arg2[%c0_7, %c6] : memref<6x27xf32, #tpu.memory_space<vmem>>, vector<6x3xf32>
    %cst_8 = arith.constant dense<0.000000e+00> : vector<6x256xf32>
    %12 = tpu.matmul %11, %10, %cst_8 {dimension_numbers = #tpu.dot_dimension_numbers<[1], [0], [0], [1], [0, 0, 1, 1], [], []>} : vector<6x3xf32>, vector<3x256xf32>, vector<6x256xf32> -> vector<6x256xf32>
    %13 = arith.addf %9, %12 : vector<6x256xf32>
    %c240_i32 = arith.constant 240 : i32
    %14 = tpu.dynamic_rotate %1 by %c240_i32 dim 1 : vector<3x256xf32>, i32 -> vector<3x256xf32>
    %c0_9 = arith.constant 0 : index
    %c9 = arith.constant 9 : index
    %15 = vector.load %arg2[%c0_9, %c9] : memref<6x27xf32, #tpu.memory_space<vmem>>, vector<6x3xf32>
    %cst_10 = arith.constant dense<0.000000e+00> : vector<6x256xf32>
    %16 = tpu.matmul %15, %14, %cst_10 {dimension_numbers = #tpu.dot_dimension_numbers<[1], [0], [0], [1], [0, 0, 1, 1], [], []>} : vector<6x3xf32>, vector<3x256xf32>, vector<6x256xf32> -> vector<6x256xf32>
    %17 = arith.addf %13, %16 : vector<6x256xf32>
    %c239_i32 = arith.constant 239 : i32
    %18 = tpu.dynamic_rotate %1 by %c239_i32 dim 1 : vector<3x256xf32>, i32 -> vector<3x256xf32>
    %c0_11 = arith.constant 0 : index
    %c12 = arith.constant 12 : index
    %19 = vector.load %arg2[%c0_11, %c12] : memref<6x27xf32, #tpu.memory_space<vmem>>, vector<6x3xf32>
    %cst_12 = arith.constant dense<0.000000e+00> : vector<6x256xf32>
    %20 = tpu.matmul %19, %18, %cst_12 {dimension_numbers = #tpu.dot_dimension_numbers<[1], [0], [0], [1], [0, 0, 1, 1], [], []>} : vector<6x3xf32>, vector<3x256xf32>, vector<6x256xf32> -> vector<6x256xf32>
    %21 = arith.addf %17, %20 : vector<6x256xf32>
    %c238_i32 = arith.constant 238 : i32
    %22 = tpu.dynamic_rotate %1 by %c238_i32 dim 1 : vector<3x256xf32>, i32 -> vector<3x256xf32>
    %c0_13 = arith.constant 0 : index
    %c15 = arith.constant 15 : index
    %23 = vector.load %arg2[%c0_13, %c15] : memref<6x27xf32, #tpu.memory_space<vmem>>, vector<6x3xf32>
    %cst_14 = arith.constant dense<0.000000e+00> : vector<6x256xf32>
    %24 = tpu.matmul %23, %22, %cst_14 {dimension_numbers = #tpu.dot_dimension_numbers<[1], [0], [0], [1], [0, 0, 1, 1], [], []>} : vector<6x3xf32>, vector<3x256xf32>, vector<6x256xf32> -> vector<6x256xf32>
    %25 = arith.addf %21, %24 : vector<6x256xf32>
    %c224_i32 = arith.constant 224 : i32
    %26 = tpu.dynamic_rotate %1 by %c224_i32 dim 1 : vector<3x256xf32>, i32 -> vector<3x256xf32>
    %c0_15 = arith.constant 0 : index
    %c18 = arith.constant 18 : index
    %27 = vector.load %arg2[%c0_15, %c18] : memref<6x27xf32, #tpu.memory_space<vmem>>, vector<6x3xf32>
    %cst_16 = arith.constant dense<0.000000e+00> : vector<6x256xf32>
    %28 = tpu.matmul %27, %26, %cst_16 {dimension_numbers = #tpu.dot_dimension_numbers<[1], [0], [0], [1], [0, 0, 1, 1], [], []>} : vector<6x3xf32>, vector<3x256xf32>, vector<6x256xf32> -> vector<6x256xf32>
    %29 = arith.addf %25, %28 : vector<6x256xf32>
    %c223_i32 = arith.constant 223 : i32
    %30 = tpu.dynamic_rotate %1 by %c223_i32 dim 1 : vector<3x256xf32>, i32 -> vector<3x256xf32>
    %c0_17 = arith.constant 0 : index
    %c21 = arith.constant 21 : index
    %31 = vector.load %arg2[%c0_17, %c21] : memref<6x27xf32, #tpu.memory_space<vmem>>, vector<6x3xf32>
    %cst_18 = arith.constant dense<0.000000e+00> : vector<6x256xf32>
    %32 = tpu.matmul %31, %30, %cst_18 {dimension_numbers = #tpu.dot_dimension_numbers<[1], [0], [0], [1], [0, 0, 1, 1], [], []>} : vector<6x3xf32>, vector<3x256xf32>, vector<6x256xf32> -> vector<6x256xf32>
    %33 = arith.addf %29, %32 : vector<6x256xf32>
    %c222_i32 = arith.constant 222 : i32
    %34 = tpu.dynamic_rotate %1 by %c222_i32 dim 1 : vector<3x256xf32>, i32 -> vector<3x256xf32>
    %c0_19 = arith.constant 0 : index
    %c24 = arith.constant 24 : index
    %35 = vector.load %arg2[%c0_19, %c24] : memref<6x27xf32, #tpu.memory_space<vmem>>, vector<6x3xf32>
    %cst_20 = arith.constant dense<0.000000e+00> : vector<6x256xf32>
    %36 = tpu.matmul %35, %34, %cst_20 {dimension_numbers = #tpu.dot_dimension_numbers<[1], [0], [0], [1], [0, 0, 1, 1], [], []>} : vector<6x3xf32>, vector<3x256xf32>, vector<6x256xf32> -> vector<6x256xf32>
    %37 = arith.addf %33, %36 : vector<6x256xf32>
    %c0_21 = arith.constant 0 : index
    %c0_22 = arith.constant 0 : index
    %38 = vector.load %arg3[%c0_21, %c0_22] : memref<6x1xf32, #tpu.memory_space<vmem>>, vector<6x1xf32>
    %39 = vector.broadcast %38 : vector<6x1xf32> to vector<6x256xf32>
    %40 = arith.addf %37, %39 : vector<6x256xf32>
    %c0_23 = arith.constant 0 : index
    %c0_24 = arith.constant 0 : index
    %c0_25 = arith.constant 0 : index
    %41 = vector.load %arg4[%c0_23, %c0_24, %c0_25] : memref<1x6x256xf32, #tpu.memory_space<vmem>>, vector<1x6x256xf32>
    %42 = vector.shape_cast %41 : vector<1x6x256xf32> to vector<6x256xf32>
    %43 = vector.shape_cast %40 : vector<6x256xf32> to vector<1x6x256xf32>
    tpu.vector_store %arg4[%c0_23, %c0_24, %c0_25], %43 {strides = array<i32>} : memref<1x6x256xf32, #tpu.memory_space<vmem>>, vector<1x6x256xf32>,
    return
  }
  func.func @transform_0(%arg0: i32) -> (i32, i32, i32) {
    %c0_i32 = arith.constant 0 : i32
    %c0_i32_0 = arith.constant 0 : i32
    %c0_i32_1 = arith.constant 0 : i32
    return %arg0, %c0_i32, %c0_i32_0 : i32, i32, i32
  }
  func.func @transform_1(%arg0: i32) -> (i32, i32) {
    %c0_i32 = arith.constant 0 : i32
    %c0_i32_0 = arith.constant 0 : i32
    %c0_i32_1 = arith.constant 0 : i32
    return %c0_i32, %c0_i32_0 : i32, i32
  }
  func.func @transform_2(%arg0: i32) -> (i32, i32) {
    %c0_i32 = arith.constant 0 : i32
    %c0_i32_0 = arith.constant 0 : i32
    %c0_i32_1 = arith.constant 0 : i32
    return %c0_i32, %c0_i32_0 : i32, i32
  }
  func.func @transform_3(%arg0: i32) -> (i32, i32, i32) {
    %c0_i32 = arith.constant 0 : i32
    %c0_i32_0 = arith.constant 0 : i32
    %c0_i32_1 = arith.constant 0 : i32
    return %arg0, %c0_i32, %c0_i32_0 : i32, i32, i32
  }
}

</mosaic_0001>

<bundles_post_ra>
// kernel: one_net_forward.1
= control target key start
LH: loop header
LB: loop body
LE: loop exit
PB: predicated region body
PF: predicated region fallthrough
CT: control target
= control target key end

     0   :  { %s1185_s12 = smov 0   ;;  %s1306_s0 = inlined_call_operand.vmem [shape: f32[2,3,256], index: 0, kind: input, shape index: {}]   ;;  %s1307_s1 = inlined_call_operand.vmem [shape: f32[6,27], index: 1, kind: input, shape index: {}]   ;;  %s1308_s2 = inlined_call_operand.vmem [shape: f32[6,1], index: 2, kind: input, shape index: {}]   ;;  %s1309_s3 = inlined_call_operand.vmem [shape: f32[2,6,256], index: 3, kind: output, shape index: {}]  }
   0x1 LB: > { %s1057_s13 = sadd.s32 4294967295, %s1146_s12   ;;  %p1061_p0 = scmp.ge.s32.totalorder %s1146_s12, 1  ;;  %s1146_s12 = sphi %s1185_s12, %s13_s12  }
   0x2   : > { %p137_p1 = scmp.lt.s32.totalorder %s1146_s12, 3 }
   0x4   : > { %p138_p2 = pnand %p1061_p0, %p137_p1 }
   0x5   : > { %v539_v0 = vld [vmem:[%s1307_s1] sm:$0x3f] (!%p138_p2)  ;;  %p161_p3 = scmp.lt.s32.totalorder (!%p138_p2), %s1057_s13, 1  ;;  %s1148_s16 = smov (!%p138_p2), 116   ;;  %v1149_v1 = vmov (!%p138_p2), 0.0   ;;  %v1161_v9 = vmov (!%p138_p2), 0   ;;  %v180_v14 = vlaneseq (!%p138_p2) }
   0x6   : > { %141 = sbr.rel (%p138_p2) target bundleno = 394 (0x18a), region = 32  ;;  %541 = vrot.lane.b32.xlu1 (!%p138_p2), %v539_v0, %s1148_s16  ;;  %615 = vmatprep.mubr.f32.mxu0 (!%p138_p2), %v1149_v1  ;;  %s1150_s21 = smov (!%p138_p2), 111   ;;  %v185_v4 = vld [vmem:[%s1307_s1] sm:$0x3f] (!%p138_p2)  ;;  %vm192_vm1 = vcmask (!%p138_p2), 1042432   ;;  %vm189_vm2 = vcmask (!%p138_p2), 23552  }
   0x7   : > { %263 = vmatprep.mubr.f32.mxu1 (!%p138_p2), %v1149_v1  ;;  %s1151_s22 = smov (!%p138_p2), 127   ;;  %s1152_s23 = smov (!%p138_p2), 110   ;;  %v631_v5 = vld [vmem:[%s1307_s1] sm:$0x3f] (!%p138_p2)  ;;  %1138 = vset.pattern.permute.xlu0 (!%p138_p2), %v1161_v9  ;;  %v1250_v15 = vand.u32 (!%p138_p2), 127, %v180_v14 }
   0x8   : > { %s1153_s26 = smov (!%p138_p2), 125   ;;  %s1154_s27 = smov (!%p138_p2), 96   ;;  %v723_v6 = vld [vmem:[%s1307_s1] sm:$0x3f] (!%p138_p2) }
   0x9   : > { %s1155_s5 = smov (!%p138_p2), 113   ;;  %s1156_s6 = smov (!%p138_p2), 126   ;;  %v815_v7 = vld [vmem:[%s1307_s1] sm:$0x3f] (!%p138_p2)  ;;  %vm536_vm0 = vcmp.lt.s32.totalorder (!%p138_p2), %v1250_v15, 111  ;;  %vm182_vm3 = vcmp.lt.s32.totalorder (!%p138_p2), %v1250_v15, 127 }
   0xa   : > { %s1157_s7 = smov (!%p138_p2), 95   ;;  %s1158_s10 = smov (!%p138_p2), 107   ;;  %v355_v8 = vld [vmem:[%s1307_s1] sm:$0x3f] (!%p138_p2)  ;;  %vm628_vm4 = vcmp.lt.s32.totalorder (!%p138_p2), %v1250_v15, 110  ;;  %vm720_vm5 = vcmp.lt.s32.totalorder (!%p138_p2), %v1250_v15, 96 }
   0xb   : > { %s1159_s15 = smov (!%p138_p2), 122   ;;  %s1160_s16 = smov (!%p138_p2), 112   ;;  %v907_v10 = vld [vmem:[%s1307_s1] sm:$0x3f] (!%p138_p2)  ;;  %vm352_vm6 = vcmp.lt.s32.totalorder (!%p138_p2), %v1250_v15, 126  ;;  %vm812_vm7 = vcmp.lt.s32.totalorder (!%p138_p2), %v1250_v15, 95 }
   0xc   : > { %v447_v11 = vld [vmem:[%s1307_s1] sm:$0x3f] (!%p138_p2)  ;;  %vm444_vm8 = vcmp.lt.s32.totalorder (!%p138_p2), %v1250_v15, 112  ;;  %vm904_vm9 = vcmp.lt.s32.totalorder (!%p138_p2), %v1250_v15, 94 }
   0xd   : > { %s1311_s13 = smov (!%p161_p3, %s1057_s13), 1  ;;  %v992_v12 = vld [vmem:[%s1308_s2] sm:$0x3f] }
   0xe   : > { %s1095_s17 = sshll.u32 %s1311_s13, 3  ;;  %v172_v32 = vld [vmem:[%s1307_s1] sm:$0x3f]  ;;  %s1096_s28 = sshll.u32 %s1311_s13, 4 }
   0xf   : > { %s165_s20 = scalar_lea.vmem %s1306_s0, %s1095_s17  ;;  %s1162_s17 = smov 94  }
  0x10   : > { %v1204_v2 = vld [vmem:[%s165_s20] sm:$0x77]  ;;  %s1163_s20 = smov 104   ;;  %s170_s4 = scalar_lea.vmem %s1309_s3, %s1096_s28 }
  0x11   : > { %532 = vrot.lane.b32.xlu0 %v1204_v2, %s1150_s21  ;;  %176 = vrot.lane.b32.xlu1 %v1204_v2, %s1151_s22  ;;  %v1210_v3 = vcombine.high %v1204_v2, %v1204_v2 }
  0x15   : > { %534 = vrot.lane.b32.xlu0 %v1210_v3, %s1150_s21  ;;  %624 = vrot.lane.b32.xlu1 %v1204_v2, %s1152_s23 }
  0x19   : > { %178 = vrot.lane.b32.xlu0 %v1210_v3, %s1151_s22  ;;  %187 = vrot.lane.b32.xlu1 %v185_v4, %s1153_s26 }
  0x1d   : > { %626 = vrot.lane.b32.xlu0 %v1210_v3, %s1152_s23  ;;  %716 = vrot.lane.b32.xlu1 %v1204_v2, %s1154_s27 }
  0x21   : > { %633 = vrot.lane.b32.xlu0 %v631_v5, %s1155_s5  ;;  %725 = vrot.lane.b32.xlu1 %v723_v6, %s1152_s23  ;;  %s1164_s23 = smov 119  }
  0x25   : > { %718 = vrot.lane.b32.xlu0 %v1210_v3, %s1154_s27  ;;  %350 = vrot.lane.b32.xlu1 %v1210_v3, %s1156_s6 }
  0x29   : > { %348 = vrot.lane.b32.xlu0 %v1204_v2, %s1156_s6  ;;  %810 = vrot.lane.b32.xlu1 %v1210_v3, %s1157_s7 }
  0x2d   : > { %808 = vrot.lane.b32.xlu0 %v1204_v2, %s1157_s7  ;;  %817 = vrot.lane.b32.xlu1 %v815_v7, %s1158_s10 }
  0x31   : > { %357 = vrot.lane.b32.xlu0 %v355_v8, %s1159_s15  ;;  %442 = vrot.lane.b32.xlu1 %v1210_v3, %s1160_s16 }
  0x35   : > { %440 = vrot.lane.b32.xlu0 %v1204_v2, %s1160_s16  ;;  %902 = vrot.lane.b32.xlu1 %v1210_v3, %s1162_s17 }
  0x39   : > { %900 = vrot.lane.b32.xlu0 %v1204_v2, %s1162_s17  ;;  %909 = vrot.lane.b32.xlu1 %v907_v10, %s1163_s20 }
  0x3d   : > { %449 = vrot.lane.b32.xlu0 %v447_v11, %s1164_s23 }
  0x41   : > { %995 = vperm.xlu0 %1138, %v992_v12  }
  0x78   : > { %v542_v13 = vpop.permute.xlu1 %541 }
  0x83   : > { %v533_v16 = vpop.permute.xlu0 %532  ;;  %v177_v17 = vpop.permute.xlu1 %176 }
  0x87   : > { %v535_v18 = vpop.permute.xlu0 %534  ;;  %v625_v19 = vpop.permute.xlu1 %624 }
  0x88   : > { %v538_v20 = vsel %vm536_vm0, %v535_v18, %v533_v16  ;;  %v537_v21 = vsel %vm536_vm0, %v533_v16, %v535_v18 }
  0x89   : > { %1078 = vmatprep.subr.msk.mxu0 %vm192_vm1, %v538_v20 }
  0x8a   : > { %1079 = vmatpush1.msk.msra.mxu0 %vm192_vm1, %v537_v21 }
  0x8b   : > { %1080 = vmatmul.mubr.msk.f32.vlgmr.msra.gmra.mrb[0].mxu0 %vm189_vm2, %v542_v13  ;;  %v179_v22 = vpop.permute.xlu0 %178  ;;  %v188_v23 = vpop.permute.xlu1 %187 }
  0x8c   : > { %v184_v24 = vsel %vm182_vm3, %v179_v22, %v177_v17  ;;  %v183_v25 = vsel %vm182_vm3, %v177_v17, %v179_v22  ;;  %707 = vmatprep.mubr.f32.mxu0 %v1149_v1 }
  0x8d   : > { %1066 = vmatprep.subr.msk.mxu1 %vm192_vm1, %v184_v24 }
  0x8e   : > { %1067 = vmatpush1.msk.msra.mxu1 %vm192_vm1, %v183_v25 }
  0x8f   : > { %v627_v26 = vpop.permute.xlu0 %626  ;;  %1068 = vmatmul.mubr.msk.f32.vlgmr.msra.gmra.mrb[0].mxu1 %vm189_vm2, %v188_v23  ;;  %v717_v27 = vpop.permute.xlu1 %716  ;;  %1069 = vmatprep.subr.msk.mxu1 %vm192_vm1, %v1210_v3 }
  0x90   : > { %v629_v28 = vsel %vm628_vm4, %v625_v19, %v627_v26  ;;  %v630_v29 = vsel %vm628_vm4, %v627_v26, %v625_v19  ;;  %1070 = vmatpush1.msk.msra.mxu1 %vm192_vm1, %v1204_v2  ;;  %341 = vmatprep.mubr.f32.mxu1 %v1149_v1 }
  0x91   : > { %1081 = vmatprep.subr.msk.mxu0 %vm192_vm1, %v630_v29 }
  0x92   : > { %1082 = vmatpush1.msk.msra.mxu0 %vm192_vm1, %v629_v28 }
  0x93   : > { %v634_v30 = vpop.permute.xlu0 %633  ;;  %v726_v31 = vpop.permute.xlu1 %725 }
  0x94   : > { %1083 = vmatmul.mubr.msk.f32.vlgmr.msra.gmra.mrb[0].mxu0 %vm189_vm2, %v634_v30 }
  0x95   : > { %799 = vmatprep.mubr.f32.mxu0 %v1149_v1 }
  0x97   : > { %v719_v33 = vpop.permute.xlu0 %718  ;;  %v351_v34 = vpop.permute.xlu1 %350  ;;  %1071 = vmatmul.mubr.msk.f32.vlgmr.msra.gmra.mrb[0].mxu1 %vm189_vm2, %v172_v32 }
  0x98   : > { %v721_v35 = vsel %vm720_vm5, %v717_v27, %v719_v33  ;;  %v722_v36 = vsel %vm720_vm5, %v719_v33, %v717_v27  ;;  %431 = vmatprep.mubr.f32.mxu1 %v1149_v1 }
  0x99   : > { %1084 = vmatprep.subr.msk.mxu0 %vm192_vm1, %v722_v36 }
  0x9a   : > { %1085 = vmatpush1.msk.msra.mxu0 %vm192_vm1, %v721_v35 }
  0x9b   : > { %v349_v37 = vpop.permute.xlu0 %348  ;;  %v811_v38 = vpop.permute.xlu1 %810 }
  0x9c   : > { %v353_v39 = vsel %vm352_vm6, %v349_v37, %v351_v34  ;;  %v354_v40 = vsel %vm352_vm6, %v351_v34, %v349_v37  ;;  %1086 = vmatmul.mubr.msk.f32.vlgmr.msra.gmra.mrb[0].mxu0 %vm189_vm2, %v726_v31 }
  0x9d   : > { %1072 = vmatprep.subr.msk.mxu1 %vm192_vm1, %v354_v40  ;;  %891 = vmatprep.mubr.f32.mxu0 %v1149_v1 }
  0x9e   : > { %1073 = vmatpush1.msk.msra.mxu1 %vm192_vm1, %v353_v39 }
  0x9f   : > { %v809_v41 = vpop.permute.xlu0 %808  ;;  %v818_v42 = vpop.permute.xlu1 %817 }
  0xa0   : > { %v813_v43 = vsel %vm812_vm7, %v809_v41, %v811_v38  ;;  %v814_v44 = vsel %vm812_vm7, %v811_v38, %v809_v41 }
  0xa1   : > { %1087 = vmatprep.subr.msk.mxu0 %vm192_vm1, %v814_v44 }
  0xa2   : > { %1088 = vmatpush1.msk.msra.mxu0 %vm192_vm1, %v813_v43 }
  0xa3   : > { %v358_v45 = vpop.permute.xlu0 %357  ;;  %v443_v46 = vpop.permute.xlu1 %442 }
  0xa4   : > { %1074 = vmatmul.mubr.msk.f32.vlgmr.msra.gmra.mrb[0].mxu1 %vm189_vm2, %v358_v45  ;;  %1089 = vmatmul.mubr.msk.f32.vlgmr.msra.gmra.mrb[0].mxu0 %vm189_vm2, %v818_v42 }
  0xa5   : > { %983 = vmatprep.mubr.f32.mxu0 %v1149_v1  ;;  %523 = vmatprep.mubr.f32.mxu1 %v1149_v1 }
  0xa7   : > { %v441_v47 = vpop.permute.xlu0 %440  ;;  %v903_v48 = vpop.permute.xlu1 %902 }
  0xa8   : > { %v445_v49 = vsel %vm444_vm8, %v441_v47, %v443_v46  ;;  %v446_v50 = vsel %vm444_vm8, %v443_v46, %v441_v47 }
  0xa9   : > { %1075 = vmatprep.subr.msk.mxu1 %vm192_vm1, %v446_v50 }
  0xaa   : > { %1076 = vmatpush1.msk.msra.mxu1 %vm192_vm1, %v445_v49 }
  0xab   : > { %v901_v51 = vpop.permute.xlu0 %900  ;;  %v910_v54 = vpop.permute.xlu1 %909 }
  0xac   : > { %v905_v52 = vsel %vm904_vm9, %v901_v51, %v903_v48  ;;  %v906_v53 = vsel %vm904_vm9, %v903_v48, %v901_v51 }
  0xad   : > { %1090 = vmatprep.subr.msk.mxu0 %vm192_vm1, %v906_v53 }
  0xae   : > { %1091 = vmatpush1.msk.msra.mxu0 %vm192_vm1, %v905_v52 }
  0xaf   : > { %1092 = vmatmul.mubr.msk.f32.vlgmr.msra.gmra.mrb[0].mxu0 %vm189_vm2, %v910_v54  ;;  %v450_v55 = vpop.permute.xlu0 %449 }
  0xb0   : > { %1077 = vmatmul.mubr.msk.f32.vlgmr.msra.gmra.mrb[0].mxu1 %vm189_vm2, %v450_v55 }
  0xc0   : > { %v996_v57 = vpop.permute.xlu0 %995 }
 0x182   : > { %v985_v56 = vpop.f32.mrb[0].mxu0 }
 0x183   : > { %v525_v58 = vpop.f32.mrb[0].mxu1  ;;  %v987_v59 = vpop.f32.mrb[1].mxu0 }
 0x184   : > { %v1097_v60 = vadd.f32 %v985_v56, %v525_v58  ;;  %v527_v61 = vpop.f32.mrb[1].mxu1 }
 0x185   : > { %v1098_v62 = vadd.f32 %v987_v59, %v527_v61 }
 0x186   : > { %v998_v63 = vadd.f32 %v1097_v60, %v996_v57 }
 0x187   : > { %v999_v0 = vadd.f32 %v1098_v62, %v996_v57 }
 0x188   : > { %1000 = vst [vmem:[%s170_s4] sm:$0x3f] %v998_v63 }
 0x189   : > { %1001 = vst [vmem:[%s170_s4 + $0x8] sm:$0x3f] %v999_v0 }
 0x18a PF: > { %s13_s12 = sadd.s32 1, %s1146_s12  }
 0x18b   : > { %p10_p4 = scmp.ge.s32.totalorder %s13_s12, 4  }
 0x18d   :  { %12 = sbr.rel (!%p10_p4) target bundleno = 1 (0x1), region = 62 }

</bundles_post_ra>
